<compile_context>
chip_gen: v6e
topology: v6e:2x2x1
jax: 0.10.0
libtpu: 0.0.40
codegen_flags: <defaults>
</compile_context>

<pallas_src>
import jax
import jax.numpy as jnp
from jax.experimental import pallas as pl
from jax.experimental.pallas import tpu as pltpu


def actor_kernel(x_ref, w1_ref, b1_ref, w2_ref, b2_ref, out_ref):
    # fc1 (f32 MXU matmul, f32 accumulate) + bias + ReLU.
    x = x_ref[...]                                                     # (TB, S) f32
    h = jnp.dot(x, w1_ref[...], preferred_element_type=jnp.float32)   # (TB, H) f32
    h = jnp.maximum(h + b1_ref[...], 0.0)

    # fc2 + bias -> logits.
    logits = jnp.dot(h, w2_ref[...], preferred_element_type=jnp.float32)  # (TB, A)
    logits = logits + b2_ref[...]

    # Numerically-stable softmax along the last dim (matches F.softmax(x, dim=-1)).
    m = jnp.max(logits, axis=-1, keepdims=True)
    e = jnp.exp(logits - m)
    denom = jnp.sum(e, axis=-1, keepdims=True)
    out_ref[...] = (e / denom).astype(out_ref.dtype)   # exact division: rows sum to 1


def _round_up(v, m):
    return ((v + m - 1) // m) * m


def _pick_batch_tile(B, block_batch):
    """Batch tile size.

    Tiny batches: one grid step with block == full array (legal regardless of
    8-row alignment). Large batches: at least 2 grid steps (sublane-aligned)
    so v7x's two TensorCores both get work, capped at block_batch.
    """
    if B <= 16:
        return B
    half = _round_up(-(-B // 2), 8)          # ceil(B/2) rounded up to a sublane multiple
    return max(8, min(block_batch, half))


def actor_forward(x, w1, b1_2d, w2, b2_2d, *, block_batch=2048):
    """x: (B, S) f32; w1: (S, H); b1_2d: (1, H); w2: (H, A); b2_2d: (1, A) -> probs (B, A) f32."""
    B, S = x.shape
    H = w1.shape[1]
    A = w2.shape[1]

    TB = _pick_batch_tile(B, block_batch)
    grid = (pl.cdiv(B, TB),)

    # Advisory cost: everything is read/written exactly once per call in f32.
    cost = pl.CostEstimate(
        flops=2 * B * H * (S + A),
        transcendentals=B * A,  # exp in the softmax
        bytes_accessed=(B * S * 4 + S * H * 4 + H * 4 + H * A * 4 + A * 4 + B * A * 4),
    )

    return pl.pallas_call(
        actor_kernel,
        out_shape=jax.ShapeDtypeStruct((B, A), jnp.float32),
        grid_spec=pl.GridSpec(
            grid=grid,
            in_specs=[
                pl.BlockSpec((TB, S), lambda i: (i, 0)),   # x: walks batch tiles
                pl.BlockSpec((S, H), lambda i: (0, 0)),    # w1: VMEM-resident
                pl.BlockSpec((1, H), lambda i: (0, 0)),    # b1: VMEM-resident
                pl.BlockSpec((H, A), lambda i: (0, 0)),    # w2: VMEM-resident
                pl.BlockSpec((1, A), lambda i: (0, 0)),    # b2: VMEM-resident
            ],
            out_specs=pl.BlockSpec((TB, A), lambda i: (i, 0)),
        ),
        compiler_params=pltpu.CompilerParams(
            # Batch tiles are independent -> shard across v7x's 2 TensorCores.
            dimension_semantics=("parallel",),
        ),
        cost_estimate=cost,
    )(x, w1, b1_2d, w2, b2_2d)


def init_params(key, state_size, action_size, hidden_size=128):
    """Deterministic init mimicking nn.Linear's default U(-1/sqrt(fan_in), 1/sqrt(fan_in)).

    Weights are stored as (in_features, out_features) — the transpose of
    PyTorch's (out, in) — and biases are pre-reshaped to (1, features) once
    here so the per-call hot path is a single pallas_call.
    """
    k1, k2, k3, k4 = jax.random.split(key, 4)
    bound1 = 1.0 / jnp.sqrt(jnp.float32(state_size))
    bound2 = 1.0 / jnp.sqrt(jnp.float32(hidden_size))
    w1 = jax.random.uniform(k1, (state_size, hidden_size), jnp.float32, -bound1, bound1)
    b1 = jax.random.uniform(k2, (1, hidden_size), jnp.float32, -bound1, bound1)
    w2 = jax.random.uniform(k3, (hidden_size, action_size), jnp.float32, -bound2, bound2)
    b2 = jax.random.uniform(k4, (1, action_size), jnp.float32, -bound2, bound2)
    return w1, b1, w2, b2


def _reference(x, w1, b1_2d, w2, b2_2d):
    h = jnp.maximum(x @ w1 + b1_2d, 0.0)
    return jax.nn.softmax(h @ w2 + b2_2d, axis=-1)


if __name__ == "__main__":
    key = jax.random.PRNGKey(0)
    state_size = 16
    hidden_size = 128   # module default; lane-dense (multiple of 128)
    action_size = 8

    kx, kp, kx2 = jax.random.split(key, 3)
    w1, b1, w2, b2 = init_params(kp, state_size, action_size, hidden_size)

    # --- small shape consistent with the module (single env step, batch=2) ---
    batch = 2
    x = jax.random.normal(kx, (batch, state_size), jnp.float32)
    probs = actor_forward(x, w1, b1, w2, b2)
    probs = jax.block_until_ready(probs)

    ref = _reference(x, w1, b1, w2, b2)
    assert probs.shape == (batch, action_size)
    assert jnp.allclose(probs, ref, atol=1e-2, rtol=1e-2)
    assert jnp.allclose(jnp.sum(probs, axis=-1), 1.0, atol=1e-4)  # exact normalization

    # --- larger batch exercising the tiled, weight-resident, >=2-step path ---
    big_batch = 256
    xb = jax.random.normal(kx2, (big_batch, state_size), jnp.float32)
    probs_b = actor_forward(xb, w1, b1, w2, b2)   # tile picker gives 2 grid steps
    probs_b = jax.block_until_ready(probs_b)
    ref_b = _reference(xb, w1, b1, w2, b2)
    assert probs_b.shape == (big_batch, action_size)
    assert jnp.allclose(probs_b, ref_b, atol=1e-2, rtol=1e-2)
    assert jnp.allclose(jnp.sum(probs_b, axis=-1), 1.0, atol=1e-4)

    print("KERNEL_OK")
</pallas_src>

<mosaic_0001>
module attributes {stable_mosaic.version = 11 : i64} {
  func.func @actor_kernel(%arg0: i32, %arg1: memref<2x16xf32, #tpu.memory_space<vmem>>, %arg2: memref<16x128xf32, #tpu.memory_space<vmem>>, %arg3: memref<1x128xf32, #tpu.memory_space<vmem>>, %arg4: memref<128x8xf32, #tpu.memory_space<vmem>>, %arg5: memref<1x8xf32, #tpu.memory_space<vmem>>, %arg6: memref<2x8xf32, #tpu.memory_space<vmem>>) attributes {dimension_semantics = [#tpu.dimension_semantics<parallel>], iteration_bounds = array<i64: 1>, scalar_prefetch = 0 : i64, scratch_operands = 0 : i64, tpu.core_type = #tpu.core_type<tc>, window_params = [{transform_indices = @transform_0, window_bounds = array<i64: 2, 16>}, {pipeline_mode = #tpu.pipeline_mode<synchronous>, transform_indices = @transform_1, window_bounds = array<i64: 16, 128>}, {pipeline_mode = #tpu.pipeline_mode<synchronous>, transform_indices = @transform_2, window_bounds = array<i64: 1, 128>}, {pipeline_mode = #tpu.pipeline_mode<synchronous>, transform_indices = @transform_3, window_bounds = array<i64: 128, 8>}, {pipeline_mode = #tpu.pipeline_mode<synchronous>, transform_indices = @transform_4, window_bounds = array<i64: 1, 8>}, {transform_indices = @transform_5, window_bounds = array<i64: 2, 8>}]} {
    %c0 = arith.constant 0 : index
    %c0_0 = arith.constant 0 : index
    %0 = vector.load %arg1[%c0, %c0_0] : memref<2x16xf32, #tpu.memory_space<vmem>>, vector<2x16xf32>
    %c0_1 = arith.constant 0 : index
    %c0_2 = arith.constant 0 : index
    %1 = vector.load %arg2[%c0_1, %c0_2] : memref<16x128xf32, #tpu.memory_space<vmem>>, vector<16x128xf32>
    %cst = arith.constant dense<0.000000e+00> : vector<2x128xf32>
    %2 = tpu.matmul %0, %1, %cst {dimension_numbers = #tpu.dot_dimension_numbers<[1], [0], [0], [1], [0, 0, 1, 1], [], []>} : vector<2x16xf32>, vector<16x128xf32>, vector<2x128xf32> -> vector<2x128xf32>
    %c0_3 = arith.constant 0 : index
    %c0_4 = arith.constant 0 : index
    %3 = vector.load %arg3[%c0_3, %c0_4] : memref<1x128xf32, #tpu.memory_space<vmem>>, vector<1x128xf32>
    %4 = vector.broadcast %3 : vector<1x128xf32> to vector<2x128xf32>
    %5 = arith.addf %2, %4 : vector<2x128xf32>
    %cst_5 = arith.constant 0.000000e+00 : f32
    %6 = vector.broadcast %cst_5 : f32 to vector<2x128xf32>
    %7 = arith.maximumf %5, %6 : vector<2x128xf32>
    %c0_6 = arith.constant 0 : index
    %c0_7 = arith.constant 0 : index
    %8 = vector.load %arg4[%c0_6, %c0_7] : memref<128x8xf32, #tpu.memory_space<vmem>>, vector<128x8xf32>
    %cst_8 = arith.constant dense<0.000000e+00> : vector<2x8xf32>
    %9 = tpu.matmul %7, %8, %cst_8 {dimension_numbers = #tpu.dot_dimension_numbers<[1], [0], [0], [1], [0, 0, 1, 1], [], []>} : vector<2x128xf32>, vector<128x8xf32>, vector<2x8xf32> -> vector<2x8xf32>
    %c0_9 = arith.constant 0 : index
    %c0_10 = arith.constant 0 : index
    %10 = vector.load %arg5[%c0_9, %c0_10] : memref<1x8xf32, #tpu.memory_space<vmem>>, vector<1x8xf32>
    %11 = vector.broadcast %10 : vector<1x8xf32> to vector<2x8xf32>
    %12 = arith.addf %9, %11 : vector<2x8xf32>
    %cst_11 = arith.constant dense<0xFF800000> : vector<2xf32>
    %13 = vector.multi_reduction <maximumf>, %12, %cst_11 [1] : vector<2x8xf32> to vector<2xf32>
    %14 = vector.shape_cast %13 : vector<2xf32> to vector<2x1xf32>
    %15 = vector.broadcast %14 : vector<2x1xf32> to vector<2x8xf32>
    %16 = arith.subf %12, %15 : vector<2x8xf32>
    %17 = math.exp %16 : vector<2x8xf32>
    %cst_12 = arith.constant dense<0.000000e+00> : vector<2xf32>
    %18 = vector.multi_reduction <add>, %17, %cst_12 [1] : vector<2x8xf32> to vector<2xf32>
    %19 = vector.shape_cast %18 : vector<2xf32> to vector<2x1xf32>
    %20 = vector.broadcast %19 : vector<2x1xf32> to vector<2x8xf32>
    %21 = arith.divf %17, %20 : vector<2x8xf32>
    %c0_13 = arith.constant 0 : index
    %c0_14 = arith.constant 0 : index
    %22 = vector.load %arg6[%c0_13, %c0_14] : memref<2x8xf32, #tpu.memory_space<vmem>>, vector<2x8xf32>
    tpu.vector_store %arg6[%c0_13, %c0_14], %21 {strides = array<i32>} : memref<2x8xf32, #tpu.memory_space<vmem>>, vector<2x8xf32>,
    return
  }
  func.func @transform_0(%arg0: i32) -> (i32, i32) {
    %c0_i32 = arith.constant 0 : i32
    %c0_i32_0 = arith.constant 0 : i32
    return %arg0, %c0_i32 : i32, i32
  }
  func.func @transform_1(%arg0: i32) -> (i32, i32) {
    %c0_i32 = arith.constant 0 : i32
    %c0_i32_0 = arith.constant 0 : i32
    %c0_i32_1 = arith.constant 0 : i32
    return %c0_i32, %c0_i32_0 : i32, i32
  }
  func.func @transform_2(%arg0: i32) -> (i32, i32) {
    %c0_i32 = arith.constant 0 : i32
    %c0_i32_0 = arith.constant 0 : i32
    %c0_i32_1 = arith.constant 0 : i32
    return %c0_i32, %c0_i32_0 : i32, i32
  }
  func.func @transform_3(%arg0: i32) -> (i32, i32) {
    %c0_i32 = arith.constant 0 : i32
    %c0_i32_0 = arith.constant 0 : i32
    %c0_i32_1 = arith.constant 0 : i32
    return %c0_i32, %c0_i32_0 : i32, i32
  }
  func.func @transform_4(%arg0: i32) -> (i32, i32) {
    %c0_i32 = arith.constant 0 : i32
    %c0_i32_0 = arith.constant 0 : i32
    %c0_i32_1 = arith.constant 0 : i32
    return %c0_i32, %c0_i32_0 : i32, i32
  }
  func.func @transform_5(%arg0: i32) -> (i32, i32) {
    %c0_i32 = arith.constant 0 : i32
    %c0_i32_0 = arith.constant 0 : i32
    return %arg0, %c0_i32 : i32, i32
  }
}

</mosaic_0001>

<bundles_post_ra>
// kernel: tpu_custom_call.1
= control target key start
LH: loop header
LB: loop body
LE: loop exit
PB: predicated region body
PF: predicated region fallthrough
CT: control target
= control target key end

     0   :  { %v320_v1 = vmov 0.0   ;;  %vm321_vm0 = vmmov 0   ;;  %vm31_vm1 = vcmask 130048   ;;  %s424_s0 = inlined_call_operand.vmem [shape: f32[2,16], index: 0, kind: input, shape index: {}]   ;;  %s425_s1 = inlined_call_operand.vmem [shape: f32[16,128], index: 1, kind: input, shape index: {}]   ;;  %s426_s2 = inlined_call_operand.vmem [shape: f32[1,128], index: 2, kind: input, shape index: {}]   ;;  %s427_s3 = inlined_call_operand.vmem [shape: f32[128,8], index: 3, kind: input, shape index: {}]   ;;  %s428_s4 = inlined_call_operand.vmem [shape: f32[1,8], index: 4, kind: input, shape index: {}]   ;;  %s429_s5 = inlined_call_operand.hbm [shape: f32[2,8], index: 5, kind: output, shape index: {}]  }
   0x1   :  { %v23_v0 = vld [vmem:[%s425_s1 + $0x8] sm:$0xff]  ;;  %249 = vmatprep.subr.mxu0 %v320_v1  ;;  %v22_v2 = vld [vmem:[%s425_s1] sm:$0xff]  ;;  %253 = vmatprep.mubr.msk.f32.mxu0 %vm321_vm0, %v320_v1  ;;  %v121_v3 = vld [vmem:[%s427_s3 + $0x78] sm:$0xff] }
   0x2   :  { %250 = vmatpush3.msra.mxu0 %v23_v0  ;;  %v21_v4 = vld [vmem:[%s424_s0] sm:$0x3]  ;;  %256 = vmatprep.subr.mxu1 %v320_v1  ;;  %v120_v5 = vld [vmem:[%s427_s3 + $0x70] sm:$0xff]  ;;  %v119_v6 = vld [vmem:[%s427_s3 + $0x68] sm:$0xff] }
   0x3   :  { %251 = vmatprep.subr.mxu0 %v320_v1  ;;  %257 = vmatpush3.msra.mxu1 %v121_v3 }
   0x4   :  { %252 = vmatpush3.msra.mxu0 %v22_v2  ;;  %258 = vmatprep.subr.mxu1 %v320_v1 }
   0x5   :  { %254 = vmatmul.mubr.msk.f32.vlgmr.msra.gmra.mxu0 %vm31_vm1, %v21_v4  ;;  %259 = vmatpush3.msra.mxu1 %v120_v5 }
   0x6   :  { %10 = vsyncpa [#allocation3], 0  ;;  %260 = vmatprep.subr.mxu1 %v320_v1  ;;  %v118_v7 = vld [vmem:[%s427_s3 + $0x60] sm:$0xff]  ;;  %288 = vmatprep.mubr.msk.f32.mxu1 %vm321_vm0, %v320_v1  ;;  %v117_v8 = vld [vmem:[%s427_s3 + $0x58] sm:$0xff]  ;;  %vm199_vm2 = vcmask 58368  }
   0x7   :  { %261 = vmatpush3.msra.mxu1 %v119_v6  ;;  %v116_v9 = vld [vmem:[%s427_s3 + $0x50] sm:$0xff]  ;;  %v115_v10 = vld [vmem:[%s427_s3 + $0x48] sm:$0xff]  ;;  %v114_v11 = vld [vmem:[%s427_s3 + $0x40] sm:$0xff] }
   0x8   :  { %262 = vmatprep.subr.mxu1 %v320_v1  ;;  %v113_v12 = vld [vmem:[%s427_s3 + $0x38] sm:$0xff]  ;;  %v112_v13 = vld [vmem:[%s427_s3 + $0x30] sm:$0xff]  ;;  %v111_v14 = vld [vmem:[%s427_s3 + $0x28] sm:$0xff] }
   0x9   :  { %263 = vmatpush3.msra.mxu1 %v118_v7  ;;  %v110_v15 = vld [vmem:[%s427_s3 + $0x20] sm:$0xff]  ;;  %v109_v16 = vld [vmem:[%s427_s3 + $0x18] sm:$0xff]  ;;  %v108_v17 = vld [vmem:[%s427_s3 + $0x10] sm:$0xff] }
   0xa   :  { %264 = vmatprep.subr.mxu1 %v320_v1  ;;  %v107_v18 = vld [vmem:[%s427_s3 + $0x8] sm:$0xff]  ;;  %v106_v19 = vld [vmem:[%s427_s3] sm:$0xff] }
   0xb   :  { %265 = vmatpush3.msra.mxu1 %v117_v8  ;;  %v226_v20 = vld [vmem:[%s426_s2] ss:$0 sm:$0xff]  ;;  %s322_s2 = smov [#allocation2]  }
   0xc   :  { %266 = vmatprep.subr.mxu1 %v320_v1  ;;  %v228_v25 = vld [vmem:[%s428_s4] ss:$0 sm:$0xff]  ;;  %s218_s3 = sshll.u32 %s322_s2, 4  ;;  %s219_s3 = int_to_ptr.vmem [resolvable:$true] %s218_s3 }
   0xd   :  { %267 = vmatpush3.msra.mxu1 %v116_v9  ;;  %s298_s4 = scalar_lea.vmem %s219_s3, 32  ;;  %p303_p1 = scmp.lt.s32.totalorder %s219_s3, %s219_s3 }
   0xe   :  { %268 = vmatprep.subr.mxu1 %v320_v1  ;;  %p299_p0 = scmp.ne.s32.totalorder %s219_s3, %s298_s4  ;;  %p304_p2 = scmp.lt.s32.totalorder %s298_s4, %s298_s4 }
   0xf   :  { %269 = vmatpush3.msra.mxu1 %v115_v10 }
  0x10   :  { %270 = vmatprep.subr.mxu1 %v320_v1  ;;  %p305_p3 = por %p304_p2, %p303_p1 }
  0x11   :  { %271 = vmatpush3.msra.mxu1 %v114_v11 }
  0x12   :  { %272 = vmatprep.subr.mxu1 %v320_v1  ;;  %p306_p4 = pnand %p305_p3, %p299_p0 }
  0x13   :  { %273 = vmatpush3.msra.mxu1 %v113_v12 }
  0x14   :  { %274 = vmatprep.subr.mxu1 %v320_v1 }
  0x15   :  { %275 = vmatpush3.msra.mxu1 %v112_v13 }
  0x16   :  { %276 = vmatprep.subr.mxu1 %v320_v1 }
  0x17   :  { %277 = vmatpush3.msra.mxu1 %v111_v14 }
  0x18   :  { %278 = vmatprep.subr.mxu1 %v320_v1 }
  0x19   :  { %279 = vmatpush3.msra.mxu1 %v110_v15 }
  0x1a   :  { %280 = vmatprep.subr.mxu1 %v320_v1 }
  0x1b   :  { %281 = vmatpush3.msra.mxu1 %v109_v16 }
  0x1c   :  { %282 = vmatprep.subr.mxu1 %v320_v1 }
  0x1d   :  { %283 = vmatpush3.msra.mxu1 %v108_v17 }
  0x1e   :  { %284 = vmatprep.subr.mxu1 %v320_v1 }
  0x1f   :  { %285 = vmatpush3.msra.mxu1 %v107_v18 }
  0x20   :  { %286 = vmatprep.subr.mxu1 %v320_v1 }
  0x21   :  { %287 = vmatpush3.msra.mxu1 %v106_v19 }
  0xc5   :  { %v101_v21 = vpop.f32.mrf.mxu0 }
  0xc6   :  { %v102_v22 = vadd.f32 %v226_v20, %v101_v21 }
  0xc7   :  { %v255_v23 = vpop.f32.mrf.mxu0 }
  0xc8   :  { %v105_v24 = vmax.f32 %v102_v22, 0.0 }
  0xca   :  { %289 = vmatmul.mubr.f32.vlgmr.msra.gmra.mxu1 %v105_v24 }
 0x18a   :  { %v195_v26 = vpop.f32.mrf.mxu1 }
 0x18b   :  { %v196_v27 = vadd.f32 %v228_v25, %v195_v26 }
 0x18c   :  { %v290_v28 = vpop.f32.mrf.mxu1 }
 0x18d   :  { %v200_v29 = vsel %vm199_vm2, %v196_v27, -inf }
 0x18e   :  { %201 = vmax.xlane.f32.xlu0 %v200_v29 }
 0x217   :  { %v202_v30 = vpop.xlane.xlu0 %201 }
 0x218   :  { %v203_v31 = vsub.f32 %v196_v27, %v202_v30 }
 0x21a   :  { %v204_v32 = vmul.f32 1.442695, %v203_v31 }
 0x21c   :  { %294 = vpow2.f32 %v204_v32 }
 0x229   :  { %v295_v33 = vpop.eup %294 }
 0x22a   :  { %v206_v34 = vsel %vm199_vm2, %v295_v33, 0.0 }
 0x22b   :  { %207 = vadd.xlane.f32.xlu0 %v206_v34 }
 0x2b4   :  { %v208_v35 = vpop.xlane.xlu0 %207 }
 0x2b5   :  { %296 = vrcp.f32 %v208_v35 }
 0x2c2   :  { %v297_v36 = vpop.eup %296 }
 0x2c3   :  { %v210_v37 = vmul.f32 %v297_v36, %v295_v33 }
 0x2c5   :  { %211 = vst.msk [vmem:[#allocation2] sm:$0x3] %vm199_vm2, %v210_v37 }
 0x2c6   :  { %309 = shalt.err (!%p306_p4)
}
 0x2c7   :  { %221 = dma.vmem_to_hbm [thread:$0]  %s219_s3, 32, %s429_s5, [#allocation3]  }
 0x2c8   :  { %318 = dma.done.wait [#allocation3], 32  }
 0x2c9   :  { %319 = vsyncadd [#allocation3], 4294967264 }
 0x2ca   :  { %225 = vsyncpa [#allocation3], 1 }

</bundles_post_ra>
